<compile_context>
chip_gen: v7x
topology: tpu7x:2x2x1
jax: 0.10.0
libtpu: 0.0.40
codegen_flags: <defaults>
</compile_context>

<pallas_src>
import math
import functools

import jax
import jax.numpy as jnp
from jax import lax
from jax.experimental import pallas as pl
from jax.experimental.pallas import tpu as pltpu


_INV_SQRT2 = 1.0 / math.sqrt(2.0)
_GELU_TANH_C = math.sqrt(2.0 / math.pi)


def _round_up(a, b):
    return (a + b - 1) // b * b


def _pick_tm(M, tm_req):
    """Row tile: as large as requested, preferring an exact divisor of M
    (avoids materializing a padded copy of the activations in HBM)."""
    tm = max(8, min(tm_req, _round_up(M, 8)))
    for cand in range(tm, 7, -8):
        if M % cand == 0:
            return cand, M
    return tm, _round_up(M, tm)


def _pick_th(H, th_req):
    """Hidden tile for the H-tiled path: lane-aligned divisor of H."""
    for cand in (th_req, 4096, 2048, 1024, 512, 256, 128):
        if cand <= H and H % cand == 0 and cand % 128 == 0:
            return cand
    return H


def _vmem_capacity_bytes():
    try:
        cap = getattr(pltpu.get_tpu_info(), "vmem_capacity_bytes", None)
        if cap:
            return int(cap)
    except Exception:
        pass
    return 64 << 20     # conservative default (= v7x per-TensorCore VMEM)


def _gelu(h, approx):
    if approx:
        # tanh-approx GELU: the tanh lands in the EUP slot (near-free on v6e/v7x),
        # leaving only a handful of VPU ops.  ~1e-3 numerics delta vs exact erf.
        return 0.5 * h * (1.0 + jnp.tanh(_GELU_TANH_C * (h + 0.044715 * h * h * h)))
    # exact (erf) GELU, matching nn.GELU() default.
    return 0.5 * h * (1.0 + lax.erf(h * _INV_SQRT2))


# ---------------------------------------------------------------------------
# Path A: whole weights resident in VMEM, 1-D grid over rows.
# ---------------------------------------------------------------------------
def _mlp_kernel_resident(x_ref, w1_ref, b1_ref, w2_ref, b2_ref, o_ref,
                         *, compute_dtype, approx_gelu):
    # Activation cast happens here (in VMEM), hidden behind the two GEMMs —
    # the wrapper never materializes a casted copy of x in HBM.
    x = x_ref[...].astype(compute_dtype)
    # c_fc: (tm, C) @ (C, H) on the MXU, f32 accumulation.
    h = jnp.dot(x, w1_ref[...], preferred_element_type=jnp.float32)
    h = _gelu(h + b1_ref[...], approx_gelu)
    # c_proj: (tm, H) @ (H, C).
    y = jnp.dot(h.astype(compute_dtype), w2_ref[...],
                preferred_element_type=jnp.float32)
    # dropout with p = 0.0 -> identity.
    o_ref[...] = (y + b2_ref[...]).astype(o_ref.dtype)


# ---------------------------------------------------------------------------
# Path B: H-tiled accumulator (large models / v7x 64 MiB VMEM).
# ---------------------------------------------------------------------------
def _mlp_kernel_htiled(x_ref, w1_ref, b1_ref, w2_ref, b2_ref, o_ref, acc_ref,
                       *, compute_dtype, approx_gelu):
    k = pl.program_id(1)

    @pl.when(k == 0)
    def _():
        acc_ref[...] = jnp.zeros_like(acc_ref)

    x = x_ref[...].astype(compute_dtype)
    h = jnp.dot(x, w1_ref[...], preferred_element_type=jnp.float32)
    h = _gelu(h + b1_ref[...], approx_gelu)
    acc_ref[...] += jnp.dot(h.astype(compute_dtype), w2_ref[...],
                            preferred_element_type=jnp.float32)

    @pl.when(k == pl.num_programs(1) - 1)
    def _():
        o_ref[...] = (acc_ref[...] + b2_ref[...]).astype(o_ref.dtype)


def mlp_forward(x, w1, b1, w2, b2, *, tm=256, th=1024,
                compute_dtype=jnp.bfloat16, out_dtype=None,
                approx_gelu=False, force_htiled=False):
    """nanoGPT MLP forward.

    x: (B, T, C). w1: (C, 4C), b1: (4C,), w2: (4C, C), b2: (C,).
    Weights are stored (in_features, out_features) — i.e. PyTorch weight.T —
    so the kernel computes y = x @ W + b directly.

    Mixed precision: MXU matmuls in `compute_dtype` (bf16 default) with f32
    accumulation; bias-add + GELU in f32.  Pass compute_dtype=jnp.float32 for a
    full-precision check.  NOTE: C and H should be multiples of 128 (ideally
    256 on v6e/v7x) for lane-dense stores / full MXU columns; GPT-2 sizes are.
    """
    B, T, C = x.shape
    H = w1.shape[1]
    M = B * T
    out_dtype = x.dtype if out_dtype is None else out_dtype

    x_isz = jnp.dtype(x.dtype).itemsize
    c_isz = jnp.dtype(compute_dtype).itemsize
    o_isz = jnp.dtype(out_dtype).itemsize

    tm, m_pad = _pick_tm(M, tm)
    grid_m = m_pad // tm

    # Activations stay in their input dtype; padding only if no tile divides M.
    x2 = x.reshape(M, C)
    if m_pad != M:
        x2 = jnp.pad(x2, ((0, m_pad - M), (0, 0)))

    # Weights cast once (each weight is read from HBM exactly once per call).
    w1c = w1.astype(compute_dtype)
    w2c = w2.astype(compute_dtype)
    b1_2 = b1.reshape(1, H).astype(jnp.float32)
    b2_2 = b2.reshape(1, C).astype(jnp.float32)

    vmem_cap = _vmem_capacity_bytes()
    vmem_budget = vmem_cap - max(12 << 20, vmem_cap // 8)   # compiler headroom

    cost = pl.CostEstimate(
        flops=4 * m_pad * C * H,                       # two GEMMs
        transcendentals=m_pad * H,                     # erf/tanh on hidden acts
        bytes_accessed=(m_pad * C * (x_isz + o_isz)
                        + 2 * C * H * c_isz + (H + C) * 4),
    )

    resident_bytes = (
        2 * C * H * c_isz                # W1 + W2 (resident, single copy)
        + (H + C) * 4                    # biases (f32)
        + 2 * tm * C * (x_isz + o_isz)   # x / out tiles (double-buffered)
        + tm * H * (4 + c_isz)           # (tm, H) f32 + compute-dtype temporaries
        + (4 << 20)                      # slack
    )

    if not force_htiled and resident_bytes <= vmem_budget:
        kernel = functools.partial(_mlp_kernel_resident,
                                   compute_dtype=compute_dtype,
                                   approx_gelu=approx_gelu)
        out2 = pl.pallas_call(
            kernel,
            out_shape=jax.ShapeDtypeStruct((m_pad, C), out_dtype),
            grid_spec=pltpu.PrefetchScalarGridSpec(
                num_scalar_prefetch=0,
                grid=(grid_m,),
                in_specs=[
                    # x row tile, pipelined over the grid (input dtype; cast in-kernel).
                    pl.BlockSpec((tm, C), lambda i: (i, 0)),
                    # Weights / biases: whole-array resident in VMEM, single copy.
                    pl.BlockSpec(memory_space=pltpu.MemorySpace.VMEM),  # W1
                    pl.BlockSpec(memory_space=pltpu.MemorySpace.VMEM),  # b1
                    pl.BlockSpec(memory_space=pltpu.MemorySpace.VMEM),  # W2
                    pl.BlockSpec(memory_space=pltpu.MemorySpace.VMEM),  # b2
                ],
                out_specs=pl.BlockSpec((tm, C), lambda i: (i, 0)),
            ),
            compiler_params=pltpu.CompilerParams(
                dimension_semantics=("parallel",),
                vmem_limit_bytes=int(min(max(resident_bytes, 16 << 20), vmem_budget)),
            ),
            cost_estimate=cost,
        )(x2, w1c, b1_2, w2c, b2_2)
    else:
        th = _pick_th(H, th)
        grid_h = H // th
        kernel = functools.partial(_mlp_kernel_htiled,
                                   compute_dtype=compute_dtype,
                                   approx_gelu=approx_gelu)
        htiled_bytes = (
            2 * 2 * C * th * c_isz           # W1/W2 blocks (double-buffered)
            + 2 * th * 4 + C * 4             # b1 blocks + b2
            + 2 * tm * C * (x_isz + o_isz)   # x / out tiles
            + tm * C * 4                     # accumulator scratch
            + tm * th * (4 + c_isz)          # (tm, th) temporaries
            + (4 << 20)                      # slack
        )
        out2 = pl.pallas_call(
            kernel,
            out_shape=jax.ShapeDtypeStruct((m_pad, C), out_dtype),
            grid_spec=pltpu.PrefetchScalarGridSpec(
                num_scalar_prefetch=0,
                grid=(grid_m, grid_h),                  # rows parallel, H reduction last
                in_specs=[
                    pl.BlockSpec((tm, C), lambda i, k: (i, 0)),         # x tile
                    pl.BlockSpec((C, th), lambda i, k: (0, k)),         # W1 col block
                    pl.BlockSpec((1, th), lambda i, k: (0, k)),         # b1 block
                    pl.BlockSpec((th, C), lambda i, k: (k, 0)),         # W2 row block
                    pl.BlockSpec(memory_space=pltpu.MemorySpace.VMEM),  # b2 (resident)
                ],
                out_specs=pl.BlockSpec((tm, C), lambda i, k: (i, 0)),
                scratch_shapes=[pltpu.VMEM((tm, C), jnp.float32)],
            ),
            compiler_params=pltpu.CompilerParams(
                dimension_semantics=("parallel", "arbitrary"),
                vmem_limit_bytes=int(min(max(htiled_bytes, 16 << 20), vmem_budget)),
            ),
            cost_estimate=cost,
        )(x2, w1c, b1_2, w2c, b2_2)

    if m_pad != M:
        out2 = out2[:M]
    return out2.reshape(B, T, C)


def mlp_reference(x, w1, b1, w2, b2):
    h = x @ w1 + b1
    h = 0.5 * h * (1.0 + lax.erf(h / jnp.sqrt(2.0).astype(h.dtype)))
    return h @ w2 + b2


if __name__ == "__main__":
    def make_params(key, B, T, C):
        H = 4 * C
        kx, k1, kb1, k2, kb2 = jax.random.split(key, 5)
        x = jax.random.normal(kx, (B, T, C), dtype=jnp.float32)
        # deterministic "nn.Linear"-style init (scaled normal); stored as (in, out)
        w1 = jax.random.normal(k1, (C, H), dtype=jnp.float32) * (1.0 / math.sqrt(C))
        b1 = jax.random.normal(kb1, (H,), dtype=jnp.float32) * 0.02
        w2 = jax.random.normal(k2, (H, C), dtype=jnp.float32) * (1.0 / math.sqrt(H))
        b2 = jax.random.normal(kb2, (C,), dtype=jnp.float32) * 0.02
        return x, w1, b1, w2, b2

    k_small, k_big = jax.random.split(jax.random.PRNGKey(0))

    # --- small config (batch=2, seq=8, n_embd=32 -> hidden=128): resident path ---
    x, w1, b1, w2, b2 = make_params(k_small, 2, 8, 32)
    ref = mlp_reference(x, w1, b1, w2, b2)

    # Default (performance) path: bf16 MXU matmuls with f32 accumulation.
    out_bf16 = jax.block_until_ready(
        jax.jit(functools.partial(mlp_forward, tm=256))(x, w1, b1, w2, b2))
    assert out_bf16.shape == (2, 8, 32)
    assert jnp.allclose(out_bf16, ref, atol=3e-2, rtol=3e-2), \
        "bf16 resident-path mismatch vs reference"

    # Full-precision path: tight check of kernel structure / GELU / bias math.
    out_f32 = jax.block_until_ready(
        jax.jit(functools.partial(mlp_forward, tm=256,
                                  compute_dtype=jnp.float32))(x, w1, b1, w2, b2))
    assert jnp.allclose(out_f32, ref, atol=1e-5, rtol=1e-5), \
        "f32 resident-path mismatch vs reference"

    # --- slightly larger config (n_embd=128 -> hidden=512): force the H-tiled
    #     accumulator fallback (the v7x large-model path) and validate it. -------
    xb, w1b, b1b, w2b, b2b = make_params(k_big, 2, 8, 128)
    refb = mlp_reference(xb, w1b, b1b, w2b, b2b)
    out_ht = jax.block_until_ready(
        jax.jit(functools.partial(mlp_forward, tm=256, th=128,
                                  compute_dtype=jnp.float32,
                                  force_htiled=True))(xb, w1b, b1b, w2b, b2b))
    assert out_ht.shape == (2, 8, 128)
    assert jnp.allclose(out_ht, refb, atol=2e-3, rtol=2e-3), \
        "f32 H-tiled-path mismatch vs reference"

    print("KERNEL_OK")
</pallas_src>

<mosaic_0001>
module attributes {stable_mosaic.version = 11 : i64} {
  func.func @_mlp_kernel_resident(%arg0: i32, %arg1: memref<16x32xf32, #tpu.memory_space<vmem>>, %arg2: memref<32x128xbf16, #tpu.memory_space<vmem>>, %arg3: memref<1x128xf32, #tpu.memory_space<vmem>>, %arg4: memref<128x32xbf16, #tpu.memory_space<vmem>>, %arg5: memref<1x32xf32, #tpu.memory_space<vmem>>, %arg6: memref<16x32xf32, #tpu.memory_space<vmem>>) attributes {dimension_semantics = [#tpu.dimension_semantics<parallel>], iteration_bounds = array<i64: 1>, scalar_prefetch = 0 : i64, scratch_operands = 0 : i64, tpu.core_type = #tpu.core_type<tc>, window_params = [{transform_indices = @transform_0, window_bounds = array<i64: 16, 32>}, {pipeline_mode = #tpu.pipeline_mode<synchronous>, transform_indices = @transform_1, window_bounds = array<i64: 32, 128>}, {pipeline_mode = #tpu.pipeline_mode<synchronous>, transform_indices = @transform_2, window_bounds = array<i64: 1, 128>}, {pipeline_mode = #tpu.pipeline_mode<synchronous>, transform_indices = @transform_3, window_bounds = array<i64: 128, 32>}, {pipeline_mode = #tpu.pipeline_mode<synchronous>, transform_indices = @transform_4, window_bounds = array<i64: 1, 32>}, {transform_indices = @transform_5, window_bounds = array<i64: 16, 32>}]} {
    %c0 = arith.constant 0 : index
    %c0_0 = arith.constant 0 : index
    %0 = vector.load %arg1[%c0, %c0_0] : memref<16x32xf32, #tpu.memory_space<vmem>>, vector<16x32xf32>
    %1 = arith.truncf %0 : vector<16x32xf32> to vector<16x32xbf16>
    %c0_1 = arith.constant 0 : index
    %c0_2 = arith.constant 0 : index
    %2 = vector.load %arg2[%c0_1, %c0_2] : memref<32x128xbf16, #tpu.memory_space<vmem>>, vector<32x128xbf16>
    %cst = arith.constant dense<0.000000e+00> : vector<16x128xf32>
    %3 = tpu.matmul %1, %2, %cst {dimension_numbers = #tpu.dot_dimension_numbers<[1], [0], [0], [1], [0, 0, 1, 1], [], []>} : vector<16x32xbf16>, vector<32x128xbf16>, vector<16x128xf32> -> vector<16x128xf32>
    %c0_3 = arith.constant 0 : index
    %c0_4 = arith.constant 0 : index
    %4 = vector.load %arg3[%c0_3, %c0_4] : memref<1x128xf32, #tpu.memory_space<vmem>>, vector<1x128xf32>
    %5 = vector.broadcast %4 : vector<1x128xf32> to vector<16x128xf32>
    %6 = arith.addf %3, %5 : vector<16x128xf32>
    %cst_5 = arith.constant 5.000000e-01 : f32
    %7 = vector.broadcast %cst_5 : f32 to vector<16x128xf32>
    %8 = arith.mulf %7, %6 : vector<16x128xf32>
    %cst_6 = arith.constant 0.707106769 : f32
    %9 = vector.broadcast %cst_6 : f32 to vector<16x128xf32>
    %10 = arith.mulf %6, %9 : vector<16x128xf32>
    %11 = math.erf %10 : vector<16x128xf32>
    %cst_7 = arith.constant 1.000000e+00 : f32
    %12 = vector.broadcast %cst_7 : f32 to vector<16x128xf32>
    %13 = arith.addf %12, %11 : vector<16x128xf32>
    %14 = arith.mulf %8, %13 : vector<16x128xf32>
    %15 = arith.truncf %14 : vector<16x128xf32> to vector<16x128xbf16>
    %c0_8 = arith.constant 0 : index
    %c0_9 = arith.constant 0 : index
    %16 = vector.load %arg4[%c0_8, %c0_9] : memref<128x32xbf16, #tpu.memory_space<vmem>>, vector<128x32xbf16>
    %cst_10 = arith.constant dense<0.000000e+00> : vector<16x32xf32>
    %17 = tpu.matmul %15, %16, %cst_10 {dimension_numbers = #tpu.dot_dimension_numbers<[1], [0], [0], [1], [0, 0, 1, 1], [], []>} : vector<16x128xbf16>, vector<128x32xbf16>, vector<16x32xf32> -> vector<16x32xf32>
    %c0_11 = arith.constant 0 : index
    %c0_12 = arith.constant 0 : index
    %18 = vector.load %arg5[%c0_11, %c0_12] : memref<1x32xf32, #tpu.memory_space<vmem>>, vector<1x32xf32>
    %19 = vector.broadcast %18 : vector<1x32xf32> to vector<16x32xf32>
    %20 = arith.addf %17, %19 : vector<16x32xf32>
    %c0_13 = arith.constant 0 : index
    %c0_14 = arith.constant 0 : index
    %21 = vector.load %arg6[%c0_13, %c0_14] : memref<16x32xf32, #tpu.memory_space<vmem>>, vector<16x32xf32>
    tpu.vector_store %arg6[%c0_13, %c0_14], %20 {strides = array<i32>} : memref<16x32xf32, #tpu.memory_space<vmem>>, vector<16x32xf32>,
    return
  }
  func.func @transform_0(%arg0: i32) -> (i32, i32) {
    %c0_i32 = arith.constant 0 : i32
    %c0_i32_0 = arith.constant 0 : i32
    return %arg0, %c0_i32 : i32, i32
  }
  func.func @transform_1(%arg0: i32) -> (i32, i32) {
    %c0_i32 = arith.constant 0 : i32
    %c0_i32_0 = arith.constant 0 : i32
    %c0_i32_1 = arith.constant 0 : i32
    return %c0_i32, %c0_i32_0 : i32, i32
  }
  func.func @transform_2(%arg0: i32) -> (i32, i32) {
    %c0_i32 = arith.constant 0 : i32
    %c0_i32_0 = arith.constant 0 : i32
    %c0_i32_1 = arith.constant 0 : i32
    return %c0_i32, %c0_i32_0 : i32, i32
  }
  func.func @transform_3(%arg0: i32) -> (i32, i32) {
    %c0_i32 = arith.constant 0 : i32
    %c0_i32_0 = arith.constant 0 : i32
    %c0_i32_1 = arith.constant 0 : i32
    return %c0_i32, %c0_i32_0 : i32, i32
  }
  func.func @transform_4(%arg0: i32) -> (i32, i32) {
    %c0_i32 = arith.constant 0 : i32
    %c0_i32_0 = arith.constant 0 : i32
    %c0_i32_1 = arith.constant 0 : i32
    return %c0_i32, %c0_i32_0 : i32, i32
  }
  func.func @transform_5(%arg0: i32) -> (i32, i32) {
    %c0_i32 = arith.constant 0 : i32
    %c0_i32_0 = arith.constant 0 : i32
    return %arg0, %c0_i32 : i32, i32
  }
}

</mosaic_0001>

<bundles_post_ra>
// kernel: mlp_forward.1
= control target key start
LH: loop header
LB: loop body
LE: loop exit
PB: predicated region body
PF: predicated region fallthrough
CT: control target
= control target key end

     0   :  { %v330_v1 = vmov 0.0   ;;  %vm331_vm0 = vmmov 0   ;;  %vm48_vm1 = vcmask 261120   ;;  %s422_s0 = inlined_call_operand.vmem [shape: f32[16,32], index: 0, kind: input, shape index: {}]   ;;  %s423_s1 = inlined_call_operand.vmem [shape: bf16[32,128], index: 1, kind: input, shape index: {}]   ;;  %s424_s2 = inlined_call_operand.vmem [shape: f32[1,128], index: 2, kind: input, shape index: {}]   ;;  %s425_s3 = inlined_call_operand.vmem [shape: bf16[128,32], index: 3, kind: input, shape index: {}]   ;;  %s426_s4 = inlined_call_operand.vmem [shape: f32[1,32], index: 4, kind: input, shape index: {}]   ;;  %s427_s5 = inlined_call_operand.hbm [shape: f32[16,32], index: 5, kind: output, shape index: {}]  }
   0x1   :  { %v292_v0 = vld [vmem:[%s423_s1] sm:$0xff]   ;;  %259 = vmatprep.subr.bf16.mxu0 %v330_v1  ;;  %v293_v2 = vld [vmem:[%s423_s1 + $0x8] sm:$0xff]   ;;  %267 = vmatprep.subr.bf16.mxu1 %v330_v1 }
   0x2   :  { %260 = vmatpush3.bf16.msra.mxu0 %v292_v0  ;;  %263 = vmatprep.mubr.msk.bf16.mxu0 %vm331_vm0, %v330_v1  ;;  %v22_v3 = vld [vmem:[%s422_s0] sm:$0xff]  ;;  %v23_v4 = vld [vmem:[%s422_s0 + $0x8] sm:$0xff] }
   0x3   :  { %261 = vmatprep.subr.bf16.mxu0 %v330_v1  ;;  %v294_v5 = vld [vmem:[%s425_s3] sm:$0xff]   ;;  %283 = vmatprep.mubr.msk.bf16.mxu1 %vm331_vm0, %v330_v1  ;;  %v295_v6 = vld [vmem:[%s425_s3 + $0x8] sm:$0xff]   ;;  %v24_v7 = vpack.c.bf16 %v23_v4, %v22_v3 }
   0x4   :  { %268 = vmatpush3.bf16.msra.mxu1 %v294_v5 }
   0x5   :  { %269 = vmatprep.subr.bf16.mxu1 %v330_v1 }
   0x6   :  { %262 = vmatpush3.bf16.msra.mxu0 %v293_v2 }
   0x8   :  { %270 = vmatpush3.bf16.msra.mxu1 %v295_v6 }
   0x9   :  { %264 = vmatmul.mubr.msk.bf16.vlgmr.msra.gmra.mrb[0].mxu0 %vm48_vm1, %v24_v7 }
   0xa   :  { %10 = vsyncpa [#allocation3], 0  ;;  %271 = vmatprep.subr.bf16.mxu1 %v330_v1  ;;  %v296_v8 = vld [vmem:[%s425_s3 + $0x10] sm:$0xff]   ;;  %v297_v9 = vld [vmem:[%s425_s3 + $0x18] sm:$0xff]   ;;  %s332_s17 = smov [#allocation2]  }
   0xb   :  { %v298_v10 = vld [vmem:[%s425_s3 + $0x20] sm:$0xff]   ;;  %v299_v11 = vld [vmem:[%s425_s3 + $0x28] sm:$0xff]   ;;  %v300_v12 = vld [vmem:[%s425_s3 + $0x30] sm:$0xff]   ;;  %s223_s18 = sshll.u32 %s332_s17, 4  ;;  %s224_s18 = int_to_ptr.vmem [resolvable:$true] %s223_s18 }
   0xc   :  { %272 = vmatpush3.bf16.msra.mxu1 %v296_v8  ;;  %v301_v13 = vld [vmem:[%s425_s3 + $0x38] sm:$0xff]   ;;  %v234_v14 = vld [vmem:[%s424_s2] ss:$0 sm:$0xff]  ;;  %s306_s19 = scalar_lea.vmem %s224_s18, 256  ;;  %p311_p1 = scmp.lt.s32.totalorder %s224_s18, %s224_s18 }
   0xd   :  { %273 = vmatprep.subr.bf16.mxu1 %v330_v1  ;;  %v238_v32 = vld [vmem:[%s426_s4] ss:$0 sm:$0xff]  ;;  %p307_p0 = scmp.ne.s32.totalorder %s224_s18, %s306_s19  ;;  %p312_p2 = scmp.lt.s32.totalorder %s306_s19, %s306_s19 }
   0xf   :  { %p313_p3 = por %p312_p2, %p311_p1 }
  0x10   :  { %274 = vmatpush3.bf16.msra.mxu1 %v297_v9 }
  0x11   :  { %275 = vmatprep.subr.bf16.mxu1 %v330_v1  ;;  %p314_p4 = pnand %p313_p3, %p307_p0 }
  0x14   :  { %276 = vmatpush3.bf16.msra.mxu1 %v298_v10 }
  0x15   :  { %277 = vmatprep.subr.bf16.mxu1 %v330_v1 }
  0x18   :  { %278 = vmatpush3.bf16.msra.mxu1 %v299_v11 }
  0x19   :  { %279 = vmatprep.subr.bf16.mxu1 %v330_v1 }
  0x1c   :  { %280 = vmatpush3.bf16.msra.mxu1 %v300_v12 }
  0x1d   :  { %281 = vmatprep.subr.bf16.mxu1 %v330_v1 }
  0x20   :  { %282 = vmatpush3.bf16.msra.mxu1 %v301_v13 }
  0xdc   :  { %v86_v15 = vpop.f32.mrb[0].mxu0 }
  0xdd   :  { %v87_v16 = vadd.f32 %v234_v14, %v86_v15  ;;  %v265_v17 = vpop.f32.mrb[1].mxu0 }
  0xde   :  { %v89_v18 = vpop.f32.mrb[2].mxu0 }
  0xdf   :  { %v95_v19 = vmul.f32 0.70710677, %v87_v16  ;;  %v90_v20 = vadd.f32 %v234_v14, %v89_v18  ;;  %v266_v21 = vpop.f32.mrb[3].mxu0  ;;  %v93_v26 = vmul.f32 0.5, %v87_v16 }
  0xe1   :  { %302 = verf.f32 %v95_v19  ;;  %v96_v22 = vmul.f32 0.70710677, %v90_v20  ;;  %v94_v27 = vmul.f32 0.5, %v90_v20 }
  0xe3   :  { %304 = verf.f32 %v96_v22 }
  0xeb   :  { %v303_v23 = vpop.eup %302 }
  0xec   :  { %v99_v24 = vadd.f32 1.0, %v303_v23 }
  0xed   :  { %v305_v25 = vpop.eup %304 }
  0xee   :  { %v100_v28 = vadd.f32 1.0, %v305_v25  ;;  %v101_v29 = vmul.f32 %v99_v24, %v93_v26 }
  0xf0   :  { %v102_v30 = vmul.f32 %v100_v28, %v94_v27 }
  0xf2   :  { %v103_v31 = vpack.c.bf16 %v102_v30, %v101_v29 }
  0xf4   :  { %284 = vmatmul.mubr.bf16.vlgmr.msra.gmra.mrb[0].mxu1 %v103_v31 }
 0x1c7   :  { %v209_v33 = vpop.f32.mrb[0].mxu1 }
 0x1c8   :  { %v210_v34 = vadd.f32 %v238_v32, %v209_v33  ;;  %v285_v35 = vpop.f32.mrb[1].mxu1 }
 0x1c9   :  { %v212_v36 = vpop.f32.mrb[2].mxu1 }
 0x1ca   :  { %216 = vst.msk [vmem:[#allocation2] sm:$0xff] %vm48_vm1, %v210_v34  ;;  %v213_v37 = vadd.f32 %v238_v32, %v212_v36  ;;  %v286_v38 = vpop.f32.mrb[3].mxu1 }
 0x1cc   :  { %217 = vst.msk [vmem:[#allocation2 + $0x8] sm:$0xff] %vm48_vm1, %v213_v37 }
 0x1cd   :  { %317 = shalt.err (!%p314_p4)
}
 0x1ce   :  { %s318_s21 = scalar_lea.hbm %s427_s5, 256 }
 0x1cf   :  { %p319_p5 = scmp.ne.s32.totalorder %s427_s5, %s318_s21  ;;  %p322_p6 = scmp.lt.u32.totalorder %s318_s21, %s427_s5 }
 0x1d1   :  { %p324_p7 = pnand %p322_p6, %p319_p5 }
 0x1d3   :  { %327 = shalt.err (!%p324_p7)
}
 0x1d4   :  { %s333_s26 = smov 128   ;;  %s334_s27 = smov 8  }
 0x1d5   :  { %229 = dma.vmem_to_hbm [thread:$0]  %s224_s18, 256, %s427_s5, [#allocation3], %s333_s26, %s333_s26, %s334_s27  }
 0x1d6   :  { %328 = dma.done.wait [#allocation3], 256  }
 0x1d7   :  { %329 = vsyncadd [#allocation3], 4294967040 }
 0x1d8   :  { %233 = vsyncpa [#allocation3], 1 }

</bundles_post_ra>
